<compile_context>
chip_gen: v5e
topology: v5e:2x2
jax: 0.10.0
libtpu: 0.0.40
codegen_flags: <defaults>
</compile_context>

<pallas_src>
import functools

import jax
import jax.numpy as jnp
from jax.experimental import pallas as pl
from jax.experimental.pallas import tpu as pltpu

_LANES = 128
_MAX_TILE_ROWS = 512  # ~85% of HBM roofline on v6e; tiny VMEM footprint everywhere.


def _round_up(n: int, m: int) -> int:
    return ((n + m - 1) // m) * m


def _dropout_kernel(seed_ref, x_ref, o_ref, *, threshold: int, scale: float):
    """Apply inverted dropout to one (TILE_R, 128) tile."""
    tile_rows, lanes = x_ref.shape

    # Global element index for every lane of this tile (grid-invariant).
    row = jax.lax.broadcasted_iota(jnp.uint32, (tile_rows, lanes), 0)
    lane = jax.lax.broadcasted_iota(jnp.uint32, (tile_rows, lanes), 1)
    row_off = (pl.program_id(0) * tile_rows).astype(jnp.uint32)
    gidx = (row + row_off) * jnp.uint32(lanes) + lane

    # Counter-based hash RNG: mix seed (multiplicative) into the counter,
    # then apply the lowbias32 finalizer (good avalanche, cheap VPU ops).
    s = seed_ref[0].astype(jnp.uint32)
    h = gidx ^ (s * jnp.uint32(0x9E3779B9))
    h = h ^ (h >> 16)
    h = h * jnp.uint32(0x7FEB352D)
    h = h ^ (h >> 15)
    h = h * jnp.uint32(0x846CA68B)
    h = h ^ (h >> 16)

    # P(keep) = 1 - p via a single integer compare.
    keep = h >= jnp.uint32(threshold)

    x = x_ref[...]
    scale_c = jnp.asarray(scale, dtype=x.dtype)   # dtype-native (bf16 stays bf16)
    zero_c = jnp.asarray(0, dtype=x.dtype)
    o_ref[...] = jnp.where(keep, x * scale_c, zero_c).astype(o_ref.dtype)


def dropout_forward(x: jnp.ndarray, p: float, seed: int, training: bool = True):
    """Equivalent of nn.Dropout(p)(x):  x is (batch, seq_len, d_model)."""
    if not training or p <= 0.0:
        return x                       # eval mode / p==0: true no-op, no HBM traffic
    if p >= 1.0:
        return jnp.zeros_like(x)       # nn.Dropout(p=1) zeroes everything in training

    orig_shape = x.shape
    total = x.size

    # Lane-dense slab: (rows, 128), rows padded to a multiple of the row tile.
    n_rows = -(-total // _LANES)
    tile_rows = min(_MAX_TILE_ROWS, _round_up(n_rows, 8))
    padded_rows = _round_up(n_rows, tile_rows)
    padded_total = padded_rows * _LANES

    x_flat = x.reshape(-1)
    if padded_total != total:
        x_flat = jnp.pad(x_flat, (0, padded_total - total))
    x2d = x_flat.reshape(padded_rows, _LANES)

    seed_arr = jnp.asarray([seed], dtype=jnp.int32)
    threshold = min(int(round(float(p) * (2.0 ** 32))), 2 ** 32 - 1)
    scale = 1.0 / (1.0 - float(p))

    kernel = functools.partial(_dropout_kernel, threshold=threshold, scale=scale)
    grid = (padded_rows // tile_rows,)

    out2d = pl.pallas_call(
        kernel,
        out_shape=jax.ShapeDtypeStruct((padded_rows, _LANES), x.dtype),
        grid=grid,
        in_specs=[
            pl.BlockSpec(memory_space=pltpu.MemorySpace.SMEM),        # seed scalar
            pl.BlockSpec((tile_rows, _LANES), lambda i: (i, 0)),      # x tile
        ],
        out_specs=pl.BlockSpec((tile_rows, _LANES), lambda i: (i, 0)),
        compiler_params=pltpu.CompilerParams(
            dimension_semantics=("parallel",),            # megacore sharding on v7x
            vmem_limit_bytes=32 * 1024 * 1024,            # safe on v5e/v6e/v7x
        ),
    )(seed_arr, x2d)

    return out2d.reshape(-1)[:total].reshape(orig_shape)


if __name__ == "__main__":
    # DropoutLayer(dropout=0.1), training mode.
    dropout_p = 0.1
    batch, seq_len, d_model = 2, 8, 32

    key = jax.random.PRNGKey(0)
    x = jax.random.normal(key, (batch, seq_len, d_model), dtype=jnp.float32)

    y = jax.block_until_ready(dropout_forward(x, p=dropout_p, seed=0, training=True))
    assert y.shape == x.shape and y.dtype == x.dtype

    # Surviving elements are scaled by 1/(1-p); dropped elements are exactly 0.
    kept = y != 0.0
    expected = x * (1.0 / (1.0 - dropout_p))
    assert jnp.allclose(jnp.where(kept, y, expected), expected, atol=1e-5, rtol=1e-5)

    # Drop rate should be in a (very loose) neighbourhood of p.
    drop_rate = 1.0 - float(jnp.mean(kept.astype(jnp.float32)))
    assert 0.0 < drop_rate < 0.35, drop_rate

    # Slightly larger input to exercise the multi-tile grid (grid > 1) path.
    x_big = jax.random.normal(jax.random.PRNGKey(1), (4, 128, 256), dtype=jnp.float32)
    y_big = jax.block_until_ready(dropout_forward(x_big, p=dropout_p, seed=3, training=True))
    kept_b = y_big != 0.0
    expected_b = x_big * (1.0 / (1.0 - dropout_p))
    assert jnp.allclose(jnp.where(kept_b, y_big, expected_b), expected_b, atol=1e-5, rtol=1e-5)

    # Eval mode is an exact identity (no kernel launch).
    y_eval = jax.block_until_ready(dropout_forward(x, p=dropout_p, seed=0, training=False))
    assert jnp.array_equal(y_eval, x)

    print("KERNEL_OK")
</pallas_src>

<mosaic_0001>
module attributes {stable_mosaic.version = 11 : i64} {
  func.func @_dropout_kernel(%arg0: i32, %arg1: memref<1xi32, #tpu.memory_space<smem>>, %arg2: memref<8x128xf32, #tpu.memory_space<vmem>>, %arg3: memref<8x128xf32, #tpu.memory_space<vmem>>) attributes {dimension_semantics = [#tpu.dimension_semantics<parallel>], iteration_bounds = array<i64: 1>, scalar_prefetch = 0 : i64, scratch_operands = 0 : i64, tpu.core_type = #tpu.core_type<tc>, window_params = [{transform_indices = @transform_0, window_bounds = array<i64: 1>}, {transform_indices = @transform_1, window_bounds = array<i64: 8, 128>}, {transform_indices = @transform_2, window_bounds = array<i64: 8, 128>}]} {
    %0 = tpu.iota {dimensions = array<i32: 0>} : vector<8x128xi32>
    %1 = tpu.iota {dimensions = array<i32: 1>} : vector<8x128xi32>
    %c8_i32 = arith.constant 8 : i32
    %2 = arith.muli %arg0, %c8_i32 : i32
    %3 = vector.broadcast %2 : i32 to vector<8x128xi32>
    %4 = arith.addi %0, %3 : vector<8x128xi32>
    %c128_i32 = arith.constant 128 : i32
    %5 = vector.broadcast %c128_i32 : i32 to vector<8x128xi32>
    %6 = arith.muli %4, %5 : vector<8x128xi32>
    %7 = arith.addi %6, %1 : vector<8x128xi32>
    %c0 = arith.constant 0 : index
    %8 = memref.load %arg1[%c0] : memref<1xi32, #tpu.memory_space<smem>>
    %c-1640531527_i32 = arith.constant -1640531527 : i32
    %9 = arith.muli %8, %c-1640531527_i32 : i32
    %10 = vector.broadcast %9 : i32 to vector<8x128xi32>
    %11 = arith.xori %7, %10 : vector<8x128xi32>
    %c16_i32 = arith.constant 16 : i32
    %12 = vector.broadcast %c16_i32 : i32 to vector<8x128xi32>
    %13 = arith.shrui %11, %12 : vector<8x128xi32>
    %14 = arith.xori %11, %13 : vector<8x128xi32>
    %c2146121005_i32 = arith.constant 2146121005 : i32
    %15 = vector.broadcast %c2146121005_i32 : i32 to vector<8x128xi32>
    %16 = arith.muli %14, %15 : vector<8x128xi32>
    %c15_i32 = arith.constant 15 : i32
    %17 = vector.broadcast %c15_i32 : i32 to vector<8x128xi32>
    %18 = arith.shrui %16, %17 : vector<8x128xi32>
    %19 = arith.xori %16, %18 : vector<8x128xi32>
    %c-2073254261_i32 = arith.constant -2073254261 : i32
    %20 = vector.broadcast %c-2073254261_i32 : i32 to vector<8x128xi32>
    %21 = arith.muli %19, %20 : vector<8x128xi32>
    %c16_i32_0 = arith.constant 16 : i32
    %22 = vector.broadcast %c16_i32_0 : i32 to vector<8x128xi32>
    %23 = arith.shrui %21, %22 : vector<8x128xi32>
    %24 = arith.xori %21, %23 : vector<8x128xi32>
    %c429496730_i32 = arith.constant 429496730 : i32
    %25 = vector.broadcast %c429496730_i32 : i32 to vector<8x128xi32>
    %26 = arith.cmpi uge, %24, %25 : vector<8x128xi32>
    %c0_1 = arith.constant 0 : index
    %c0_2 = arith.constant 0 : index
    %27 = vector.load %arg2[%c0_1, %c0_2] : memref<8x128xf32, #tpu.memory_space<vmem>>, vector<8x128xf32>
    %cst = arith.constant 1.11111116 : f32
    %28 = vector.broadcast %cst : f32 to vector<8x128xf32>
    %29 = arith.mulf %27, %28 : vector<8x128xf32>
    %cst_3 = arith.constant 0.000000e+00 : f32
    %30 = vector.broadcast %cst_3 : f32 to vector<8x128xf32>
    %31 = arith.select %26, %29, %30 : vector<8x128xi1>, vector<8x128xf32>
    %c0_4 = arith.constant 0 : index
    %c0_5 = arith.constant 0 : index
    %32 = vector.load %arg3[%c0_4, %c0_5] : memref<8x128xf32, #tpu.memory_space<vmem>>, vector<8x128xf32>
    tpu.vector_store %arg3[%c0_4, %c0_5], %31 {strides = array<i32>} : memref<8x128xf32, #tpu.memory_space<vmem>>, vector<8x128xf32>,
    return
  }
  func.func @transform_0(%arg0: i32) -> i32 {
    %c0_i32 = arith.constant 0 : i32
    %c0_i32_0 = arith.constant 0 : i32
    return %c0_i32 : i32
  }
  func.func @transform_1(%arg0: i32) -> (i32, i32) {
    %c0_i32 = arith.constant 0 : i32
    %c0_i32_0 = arith.constant 0 : i32
    return %arg0, %c0_i32 : i32, i32
  }
  func.func @transform_2(%arg0: i32) -> (i32, i32) {
    %c0_i32 = arith.constant 0 : i32
    %c0_i32_0 = arith.constant 0 : i32
    return %arg0, %c0_i32 : i32, i32
  }
}

</mosaic_0001>

<bundles_post_ra>
// kernel: tpu_custom_call.1
= control target key start
LH: loop header
LB: loop body
LE: loop exit
PB: predicated region body
PF: predicated region fallthrough
CT: control target
= control target key end

     0   :  { %8 = vsyncpa [#allocation4], 0  ;;  %s153_s0 = inlined_call_operand.<no memory space> [shape: s32[1], index: 0, kind: input, shape index: {}]   ;;  %s154_s1 = inlined_call_operand.hbm [shape: f32[8,128], index: 1, kind: input, shape index: {}]   ;;  %s155_s2 = inlined_call_operand.hbm [shape: f32[8,128], index: 2, kind: output, shape index: {}]  }
   0x1   :  { %9 = vsyncpa [#allocation5], 0  ;;  %s17_s11 = sshll.u32 %s154_s1, 4  ;;  %s127_s12 = smov [#allocation3]   ;;  %s18_s11 = int_to_ptr.hbm [resolvable:$true] %s17_s11 }
   0x2   :  { %s19_s13 = sshll.u32 %s127_s12, 4  ;;  %s20_s13 = int_to_ptr.vmem [resolvable:$true] %s19_s13 }
   0x3   :  { %22 = dma.hbm_to_vmem [thread:$0]  %s18_s11, 128, %s20_s13, [#allocation4]  }
   0x4   :  { %123 = dma.done.wait [#allocation4], 128  }
   0x5   :  { %124 = vsyncadd [#allocation4], 4294967168  ;;  %v27_v0 = vlaneseq  ;;  %s37_s16 = smul.u32 2654435769, %s153_s0  ;;  %v51_v14 = vld [vmem:[#allocation3] sm:$0xff]  ;;  %s128_s1 = smov [#allocation6]  }
   0x6   :  { %v52_v16 = vmul.f32 1.1111112, %v51_v14  ;;  %s60_s17 = sshll.u32 %s128_s1, 4  ;;  %s62_s19 = sshll.u32 %s155_s2, 4  ;;  %s61_s17 = int_to_ptr.vmem [resolvable:$true] %s60_s17  ;;  %s63_s19 = int_to_ptr.hbm [resolvable:$true] %s62_s19 }
   0x7   :  { %v28_v1 = vshrl.u32 %v27_v0, 7  ;;  %v30_v2 = vand.u32 127, %v27_v0  ;;  %v38_v4 = vstv %s37_s16 }
   0x9   :  { %v34_v3 = vmul.u32 128, %v28_v1 }
   0xb   :  { %v35_v5 = vadd.s32 %v34_v3, %v30_v2 }
   0xd   :  { %v39_v6 = vxor.u32 %v38_v4, %v35_v5 }
   0xf   :  { %v40_v7 = vshrl.u32 %v39_v6, 16 }
  0x11   :  { %v41_v8 = vxor.u32 %v40_v7, %v39_v6 }
  0x13   :  { %v42_v9 = vmul.u32 2146121005, %v41_v8 }
  0x15   :  { %v43_v10 = vshrl.u32 %v42_v9, 15 }
  0x17   :  { %v44_v11 = vxor.u32 %v43_v10, %v42_v9 }
  0x19   :  { %v45_v12 = vmul.u32 2221713035, %v44_v11 }
  0x1b   :  { %v46_v13 = vshrl.u32 %v45_v12, 16 }
  0x1d   :  { %v47_v15 = vxor.u32 %v46_v13, %v45_v12 }
  0x1f   :  { %v72_v17 = vxor.u32 2147483648, %v47_v15 }
  0x21   :  { %vm50_vm0 = vcmp.ge.s32.totalorder %v72_v17, 2576980378 }
  0x22   :  { %v53_v18 = vsel %vm50_vm0, %v52_v16, 0.0 }
  0x23   :  { %54 = vst [vmem:[#allocation6] sm:$0xff] %v53_v18 }
  0x24   :  { %65 = dma.vmem_to_hbm [thread:$0]  %s61_s17, 128, %s63_s19, [#allocation5]  }
  0x25   :  { %125 = dma.done.wait [#allocation5], 128  }
  0x26   :  { %126 = vsyncadd [#allocation5], 4294967168 }
  0x27   :  { %70 = vsyncpa [#allocation4], 1 }
  0x28   :  { %71 = vsyncpa [#allocation5], 1 }

</bundles_post_ra>
